<compile_context>
chip_gen: v7x
topology: tpu7x:2x2x1
jax: 0.10.0
libtpu: 0.0.40
codegen_flags: <defaults>
</compile_context>

<pallas_src>
import functools

import jax
import jax.numpy as jnp
from jax.experimental import pallas as pl
from jax.experimental.pallas import tpu as pltpu


def _query_vmem_capacity():
    try:
        return int(pltpu.get_tpu_info().vmem_capacity_bytes)
    except Exception:  # conservative fallback = v7x per-TensorCore VMEM
        return 64 << 20


def _resident_bytes(D, mm_bytes):
    # W^T (assume double-buffered even though its index_map is constant) + f32 bias.
    return 2 * D * D * mm_bytes + 2 * D * 4


def _tile_bytes(B, D, tc, x_bytes, mm_bytes):
    blk = B * tc * D
    streamed = 2 * (2 * blk * x_bytes)           # x and out blocks, double-buffered
    temps = 4 * blk * 4                          # y / centered / y_hat / gate f32 temporaries
    if mm_bytes != x_bytes:
        temps += blk * mm_bytes                  # MXU-feed copy of the x block
    return streamed + temps


def _pick_tc(C, B, D, x_bytes, mm_bytes):
    """Largest channel tile (divisor of C) that fits the per-generation VMEM budget,
    is 8-aligned (or full-extent), and keeps >= 2 grid steps when possible."""
    cap = _query_vmem_capacity()
    budget = max(int(cap * 0.70) - _resident_bytes(D, mm_bytes), 2 << 20)
    # Candidates: divisors of C whose block second-to-last dim is (8,128)-legal.
    cands = [d for d in range(1, C + 1) if C % d == 0 and (d % 8 == 0 or d == C)]
    fits = [d for d in cands if _tile_bytes(B, D, d, x_bytes, mm_bytes) <= budget]
    if not fits:
        # NOTE: if even the smallest legal tile outgrows VMEM, BN would need a two-phase
        # (sum/sumsq accumulate -> finalize) grid over B; not needed at these sizes.
        fits = [min(cands)]
    # Keep >= 2 grid steps when possible so the "parallel" axis can shard across the
    # two v7x TensorCores (also amortizes per-step overhead elsewhere).
    multi = [d for d in fits if C // d >= 2]
    pool = multi if multi else fits
    return max(pool)


def _vmem_limit(B, D, tc, x_bytes, mm_bytes):
    cap = int(_query_vmem_capacity() * 0.75)     # ~48 MiB on v7x, ~96 MiB on v5e/v6e
    est = _resident_bytes(D, mm_bytes) + _tile_bytes(B, D, tc, x_bytes, mm_bytes)
    return int(min(cap, max(2 * est + (4 << 20), 32 << 20)))


def context_gating_kernel(x_ref, wt_ref, b_ref, g_ref, bt_ref, o_ref, *,
                          mm_dtype, add_batch_norm):
    B, Tc, D = x_ref.shape

    # ---- fc: y = x @ W^T + b on the MXU (W^T pre-transposed & pre-cast in the wrapper) ----
    xm = x_ref[...].astype(mm_dtype).reshape(B * Tc, D)
    y = jnp.dot(xm, wt_ref[...], preferred_element_type=jnp.float32)
    y = (y + b_ref[...]).reshape(B, Tc, D)

    if add_batch_norm:
        # ---- BatchNorm1d, training mode: per-channel stats over (B, D), biased variance ----
        count = jnp.float32(B * D)
        mean = jnp.sum(y, axis=(0, 2), keepdims=True) / count         # (1, Tc, 1)
        centered = y - mean
        var = jnp.sum(centered * centered, axis=(0, 2), keepdims=True) / count
        inv = jax.lax.rsqrt(var + 1e-5)
        # Fold the affine into per-channel scale/shift (tiny (1, Tc, 1) tensors).
        scale = inv * g_ref[...]                                        # (1, Tc, 1)
        shift = bt_ref[...] - mean * scale
        y_hat = y * scale + shift
    else:
        y_hat = y

    # ---- GLU(cat(x, y_hat), -1) == x * sigmoid(y_hat) ----
    o_ref[...] = (x_ref[...].astype(jnp.float32) * jax.nn.sigmoid(y_hat)).astype(o_ref.dtype)


def context_gating(x, w, b, gamma, beta, *, tc=None, mm_dtype=jnp.bfloat16,
                   add_batch_norm=True):
    """x: (B, C, D); w: (D, D) nn.Linear weight (out, in); b: (D,);
    gamma/beta: (C,) BatchNorm1d affine params. Returns (B, C, D)."""
    B, C, D = x.shape

    wt = jnp.transpose(w).astype(mm_dtype)            # (D_in, D_out) pre-cast MXU feed
    b2 = b.reshape(1, D).astype(jnp.float32)
    g3 = gamma.reshape(1, C, 1).astype(jnp.float32)
    bt3 = beta.reshape(1, C, 1).astype(jnp.float32)

    x_bytes = jnp.dtype(x.dtype).itemsize
    mm_bytes = jnp.dtype(mm_dtype).itemsize
    if tc is None:
        tc = _pick_tc(C, B, D, x_bytes, mm_bytes)
    assert C % tc == 0 and (tc % 8 == 0 or tc == C), (C, tc)

    kernel = functools.partial(context_gating_kernel, mm_dtype=mm_dtype,
                               add_batch_norm=add_batch_norm)
    return pl.pallas_call(
        kernel,
        out_shape=jax.ShapeDtypeStruct((B, C, D), x.dtype),
        grid=(C // tc,),
        in_specs=[
            pl.BlockSpec((B, tc, D), lambda c: (0, c, 0)),    # x: one channel block per step
            pl.BlockSpec((D, D), lambda c: (0, 0)),           # W^T: VMEM-resident across grid
            pl.BlockSpec((1, D), lambda c: (0, 0)),           # bias: resident
            pl.BlockSpec((1, tc, 1), lambda c: (0, c, 0)),    # gamma per channel block
            pl.BlockSpec((1, tc, 1), lambda c: (0, c, 0)),    # beta per channel block
        ],
        out_specs=pl.BlockSpec((B, tc, D), lambda c: (0, c, 0)),
        compiler_params=pltpu.CompilerParams(
            dimension_semantics=("parallel",),
            vmem_limit_bytes=_vmem_limit(B, D, tc, x_bytes, mm_bytes),
        ),
    )(x, wt, b2, g3, bt3)


def context_gating_ref(x, w, b, gamma, beta):
    """Pure-JAX reference reproducing the PyTorch forward (training-mode BN)."""
    y = jnp.einsum("bcd,ed->bce", x, w) + b
    mean = jnp.mean(y, axis=(0, 2), keepdims=True)
    var = jnp.mean((y - mean) ** 2, axis=(0, 2), keepdims=True)
    y_hat = (y - mean) / jnp.sqrt(var + 1e-5) * gamma[None, :, None] + beta[None, :, None]
    return x * jax.nn.sigmoid(y_hat)


if __name__ == "__main__":
    B, C, D = 2, 16, 32  # batch, channels, dimension

    key = jax.random.PRNGKey(0)
    kx, kw, kb = jax.random.split(key, 3)

    x = jax.random.normal(kx, (B, C, D), dtype=jnp.float32)
    # nn.Linear(dimension, dimension): weight (D, D), bias (D,)
    bound = 1.0 / jnp.sqrt(jnp.float32(D))
    w = jax.random.uniform(kw, (D, D), minval=-bound, maxval=bound, dtype=jnp.float32)
    b = jax.random.uniform(kb, (D,), minval=-bound, maxval=bound, dtype=jnp.float32)
    # BatchNorm1d(channels) affine params at PyTorch init values
    gamma = jnp.ones((C,), dtype=jnp.float32)
    beta = jnp.zeros((C,), dtype=jnp.float32)

    ref = context_gating_ref(x, w, b, gamma, beta)

    # f32 MXU feed (tight exactness check); tc=8 -> 2-step parallel grid.
    out_f32 = jax.block_until_ready(
        context_gating(x, w, b, gamma, beta, tc=8, mm_dtype=jnp.float32))
    assert out_f32.shape == (B, C, D)
    assert jnp.allclose(out_f32, ref, rtol=1e-4, atol=1e-4), "f32 path mismatch vs reference"

    # Default path: auto tile selection + bf16 MXU feed with f32 accumulation.
    out = jax.block_until_ready(context_gating(x, w, b, gamma, beta))
    assert out.shape == (B, C, D)
    assert jnp.allclose(out, ref, rtol=5e-2, atol=5e-2), "bf16 path mismatch vs reference"

    print("KERNEL_OK")
</pallas_src>

<mosaic_0001>
module attributes {stable_mosaic.version = 11 : i64} {
  func.func @context_gating_kernel(%arg0: i32, %arg1: memref<2x8x32xf32, #tpu.memory_space<vmem>>, %arg2: memref<32x32xf32, #tpu.memory_space<vmem>>, %arg3: memref<1x32xf32, #tpu.memory_space<vmem>>, %arg4: memref<1x8x1xf32, #tpu.memory_space<vmem>>, %arg5: memref<1x8x1xf32, #tpu.memory_space<vmem>>, %arg6: memref<2x8x32xf32, #tpu.memory_space<vmem>>) attributes {dimension_semantics = [#tpu.dimension_semantics<parallel>], iteration_bounds = array<i64: 2>, scalar_prefetch = 0 : i64, scratch_operands = 0 : i64, tpu.core_type = #tpu.core_type<tc>, window_params = [{transform_indices = @transform_0, window_bounds = array<i64: 2, 8, 32>}, {pipeline_mode = #tpu.pipeline_mode<synchronous>, transform_indices = @transform_1, window_bounds = array<i64: 32, 32>}, {pipeline_mode = #tpu.pipeline_mode<synchronous>, transform_indices = @transform_2, window_bounds = array<i64: 1, 32>}, {transform_indices = @transform_3, window_bounds = array<i64: 1, 8, 1>}, {transform_indices = @transform_4, window_bounds = array<i64: 1, 8, 1>}, {transform_indices = @transform_5, window_bounds = array<i64: 2, 8, 32>}]} {
    %c0 = arith.constant 0 : index
    %c0_0 = arith.constant 0 : index
    %c0_1 = arith.constant 0 : index
    %0 = vector.load %arg1[%c0, %c0_0, %c0_1] : memref<2x8x32xf32, #tpu.memory_space<vmem>>, vector<2x8x32xf32>
    %1 = vector.shape_cast %0 : vector<2x8x32xf32> to vector<16x32xf32>
    %c0_2 = arith.constant 0 : index
    %c0_3 = arith.constant 0 : index
    %2 = vector.load %arg2[%c0_2, %c0_3] : memref<32x32xf32, #tpu.memory_space<vmem>>, vector<32x32xf32>
    %cst = arith.constant dense<0.000000e+00> : vector<16x32xf32>
    %3 = tpu.matmul %1, %2, %cst {dimension_numbers = #tpu.dot_dimension_numbers<[1], [0], [0], [1], [0, 0, 1, 1], [], []>} : vector<16x32xf32>, vector<32x32xf32>, vector<16x32xf32> -> vector<16x32xf32>
    %c0_4 = arith.constant 0 : index
    %c0_5 = arith.constant 0 : index
    %4 = vector.load %arg3[%c0_4, %c0_5] : memref<1x32xf32, #tpu.memory_space<vmem>>, vector<1x32xf32>
    %5 = vector.broadcast %4 : vector<1x32xf32> to vector<16x32xf32>
    %6 = arith.addf %3, %5 : vector<16x32xf32>
    %7 = vector.shape_cast %6 : vector<16x32xf32> to vector<2x8x32xf32>
    %cst_6 = arith.constant dense<0.000000e+00> : vector<8xf32>
    %8 = vector.multi_reduction <add>, %7, %cst_6 [0, 2] : vector<2x8x32xf32> to vector<8xf32>
    %9 = vector.shape_cast %8 : vector<8xf32> to vector<1x8x1xf32>
    %cst_7 = arith.constant 6.400000e+01 : f32
    %10 = vector.broadcast %cst_7 : f32 to vector<1x8x1xf32>
    %11 = arith.divf %9, %10 : vector<1x8x1xf32>
    %12 = vector.broadcast %11 : vector<1x8x1xf32> to vector<2x8x32xf32>
    %13 = arith.subf %7, %12 : vector<2x8x32xf32>
    %14 = arith.mulf %13, %13 : vector<2x8x32xf32>
    %cst_8 = arith.constant dense<0.000000e+00> : vector<8xf32>
    %15 = vector.multi_reduction <add>, %14, %cst_8 [0, 2] : vector<2x8x32xf32> to vector<8xf32>
    %16 = vector.shape_cast %15 : vector<8xf32> to vector<1x8x1xf32>
    %cst_9 = arith.constant 6.400000e+01 : f32
    %17 = vector.broadcast %cst_9 : f32 to vector<1x8x1xf32>
    %18 = arith.divf %16, %17 : vector<1x8x1xf32>
    %cst_10 = arith.constant 9.99999974E-6 : f32
    %19 = vector.broadcast %cst_10 : f32 to vector<1x8x1xf32>
    %20 = arith.addf %18, %19 : vector<1x8x1xf32>
    %21 = math.rsqrt %20 : vector<1x8x1xf32>
    %c0_11 = arith.constant 0 : index
    %c0_12 = arith.constant 0 : index
    %c0_13 = arith.constant 0 : index
    %22 = vector.load %arg4[%c0_11, %c0_12, %c0_13] : memref<1x8x1xf32, #tpu.memory_space<vmem>>, vector<1x8x1xf32>
    %23 = arith.mulf %21, %22 : vector<1x8x1xf32>
    %c0_14 = arith.constant 0 : index
    %c0_15 = arith.constant 0 : index
    %c0_16 = arith.constant 0 : index
    %24 = vector.load %arg5[%c0_14, %c0_15, %c0_16] : memref<1x8x1xf32, #tpu.memory_space<vmem>>, vector<1x8x1xf32>
    %25 = arith.mulf %11, %23 : vector<1x8x1xf32>
    %26 = arith.subf %24, %25 : vector<1x8x1xf32>
    %27 = vector.broadcast %23 : vector<1x8x1xf32> to vector<2x8x32xf32>
    %28 = arith.mulf %7, %27 : vector<2x8x32xf32>
    %29 = vector.broadcast %26 : vector<1x8x1xf32> to vector<2x8x32xf32>
    %30 = arith.addf %28, %29 : vector<2x8x32xf32>
    %c0_17 = arith.constant 0 : index
    %c0_18 = arith.constant 0 : index
    %c0_19 = arith.constant 0 : index
    %31 = vector.load %arg1[%c0_17, %c0_18, %c0_19] : memref<2x8x32xf32, #tpu.memory_space<vmem>>, vector<2x8x32xf32>
    %32 = arith.negf %30 : vector<2x8x32xf32>
    %33 = math.exp %32 : vector<2x8x32xf32>
    %cst_20 = arith.constant 1.000000e+00 : f32
    %34 = vector.broadcast %cst_20 : f32 to vector<2x8x32xf32>
    %35 = arith.addf %34, %33 : vector<2x8x32xf32>
    %36 = arith.divf %34, %35 : vector<2x8x32xf32>
    %37 = arith.mulf %31, %36 : vector<2x8x32xf32>
    %c0_21 = arith.constant 0 : index
    %c0_22 = arith.constant 0 : index
    %c0_23 = arith.constant 0 : index
    %38 = vector.load %arg6[%c0_21, %c0_22, %c0_23] : memref<2x8x32xf32, #tpu.memory_space<vmem>>, vector<2x8x32xf32>
    tpu.vector_store %arg6[%c0_21, %c0_22, %c0_23], %37 {strides = array<i32>} : memref<2x8x32xf32, #tpu.memory_space<vmem>>, vector<2x8x32xf32>,
    return
  }
  func.func @transform_0(%arg0: i32) -> (i32, i32, i32) {
    %c0_i32 = arith.constant 0 : i32
    %c0_i32_0 = arith.constant 0 : i32
    %c0_i32_1 = arith.constant 0 : i32
    return %c0_i32, %arg0, %c0_i32_0 : i32, i32, i32
  }
  func.func @transform_1(%arg0: i32) -> (i32, i32) {
    %c0_i32 = arith.constant 0 : i32
    %c0_i32_0 = arith.constant 0 : i32
    %c0_i32_1 = arith.constant 0 : i32
    return %c0_i32, %c0_i32_0 : i32, i32
  }
  func.func @transform_2(%arg0: i32) -> (i32, i32) {
    %c0_i32 = arith.constant 0 : i32
    %c0_i32_0 = arith.constant 0 : i32
    %c0_i32_1 = arith.constant 0 : i32
    return %c0_i32, %c0_i32_0 : i32, i32
  }
  func.func @transform_3(%arg0: i32) -> (i32, i32, i32) {
    %c0_i32 = arith.constant 0 : i32
    %c0_i32_0 = arith.constant 0 : i32
    %c0_i32_1 = arith.constant 0 : i32
    return %c0_i32, %arg0, %c0_i32_0 : i32, i32, i32
  }
  func.func @transform_4(%arg0: i32) -> (i32, i32, i32) {
    %c0_i32 = arith.constant 0 : i32
    %c0_i32_0 = arith.constant 0 : i32
    %c0_i32_1 = arith.constant 0 : i32
    return %c0_i32, %arg0, %c0_i32_0 : i32, i32, i32
  }
  func.func @transform_5(%arg0: i32) -> (i32, i32, i32) {
    %c0_i32 = arith.constant 0 : i32
    %c0_i32_0 = arith.constant 0 : i32
    %c0_i32_1 = arith.constant 0 : i32
    return %c0_i32, %arg0, %c0_i32_0 : i32, i32, i32
  }
}

</mosaic_0001>

<bundles_post_ra>
// kernel: tpu_custom_call.1
= control target key start
LH: loop header
LB: loop body
LE: loop exit
PB: predicated region body
PF: predicated region fallthrough
CT: control target
= control target key end

     0   :  { %10 = vsyncpa [#allocation4], 0  ;;  %s1008_s0 = inlined_call_operand.vmem [shape: f32[2,16,32], index: 0, kind: input, shape index: {}]   ;;  %s1009_s1 = inlined_call_operand.hbm [shape: f32[32,32], index: 1, kind: input, shape index: {}]   ;;  %s1010_s2 = inlined_call_operand.vmem [shape: f32[1,32], index: 2, kind: input, shape index: {}]   ;;  %s1011_s3 = inlined_call_operand.vmem [shape: f32[1,16,1], index: 3, kind: input, shape index: {}]   ;;  %s1012_s4 = inlined_call_operand.vmem [shape: f32[1,16,1], index: 4, kind: input, shape index: {}]   ;;  %s1013_s5 = inlined_call_operand.hbm [shape: f32[2,16,32], index: 5, kind: output, shape index: {}]  }
   0x1   :  { %11 = vsyncpa [#allocation5], 0 }
   0x2   :  { %13 = vsyncpa [#allocation5 + $0x1], 0  ;;  %s824_s18 = smov 0   ;;  %s826_s19 = smov 0  }
   0x3   :  { %s828_s20 = smov 0   ;;  %s830_s21 = smov 0  }
   0x4 LB: > { %s845_s22 = sadd.s32 4294967295, %s784_s21   ;;  %s576_s23 = sadd.s32 4294967294, %s784_s21   ;;  %s784_s21 = sphi %s830_s21, %s1031_s21   ;;  %s780_s20 = sphi %s828_s20, %s1030_s20   ;;  %s776_s19 = sphi %s826_s19, %s1029_s19   ;;  %s772_s18 = sphi %s824_s18, %s1028_s18  }
   0x5   : > { %s849_s24 = sadd.s32 1, %s784_s21   ;;  %s26_s25 = sadd.s32 1, %s780_s20 }
   0x6   : > { %s23_s26 = ssub.s32 %s784_s21, %s849_s24  ;;  %p33_p0 = scmp.ne.s32.totalorder %s780_s20, %s776_s19 }
   0x7   : > { %p24_p1 = scmp.eq.s32.totalorder %s23_s26, 0  ;;  %p34_p2 = scmp.eq.s32.totalorder %s784_s21, 0 }
   0x8   : > { %p157_p3 = scmp.eq.s32.totalorder %s845_s22, 1  ;;  %p162_p4 = scmp.ne.s32.totalorder %s776_s19, %s772_s18 }
   0x9   : > { %s861_s27 = scalar_select %p24_p1, %s780_s20, %s26_s25  }
   0xa   : > { %p863_p5 = por %p34_p2, %p33_p0  ;;  %p867_p6 = por %p157_p3, %p33_p0 }
   0xb   : > { %p163_p7 = scmp.eq.s32.totalorder %s576_s23, 1  ;;  %p577_p8 = scmp.ge.s32.totalorder %s784_s21, 1 }
   0xc   : > { %s1017_s28 = scalar_select %p863_p5, 1, 0 }
   0xd   : > { %s1018_s29 = scalar_select %p867_p6, 1, 0 }
   0xe   : > { %p170_p9 = scmp.lt.s32.totalorder %s784_s21, 3  ;;  %p873_p10 = por %p163_p7, %p162_p4 }
   0xf   : > { %p1014_p11 = scmp.eq.s32.totalorder %s845_s22, 0  ;;  %s786_s7 = smov [#allocation3]  }
  0x10   : > { %s1019_s30 = scalar_select %p873_p10, 1, 0 }
  0x11   : > { %p878_p12 = pnand %p577_p8, %p170_p9  ;;  %s182_s8 = sshll.u32 %s786_s7, 4  ;;  %s183_s8 = int_to_ptr.vmem [resolvable:$true] %s182_s8 }
  0x12   : > { %s690_s12 = scalar_lea.hbm %s1009_s1, 512 }
  0x13   : > { %s1020_s6 = scalar_select %p878_p12, 1, 0 }
  0x14   : > { %p628_p13 = pneg %p878_p12  ;;  %p691_p1 = scmp.ne.s32.totalorder %s1009_s1, %s690_s12 }
  0x15   : > { %p697_p7 = scmp.lt.u32.totalorder %s690_s12, %s1009_s1 }
  0x16   : > { %p886_p0 = pnand %p1014_p11, %p628_p13 }
  0x18   : > { %p692_p2 = pneg %p886_p0 }
  0x1a   : > { %p693_p3 = pnand %p692_p2, %p691_p1 }
  0x1c   : > { %p694_p4 = pneg %p693_p3 }
  0x1e   : > { %p699_p8 = pnand %p697_p7, %p694_p4 }
  0x20   : > { %702 = shalt.err (!%p699_p8)
}
  0x21   : > { %s703_s17 = scalar_lea.vmem %s183_s8, 512  ;;  %p711_p10 = scmp.lt.s32.totalorder %s183_s8, %s183_s8 }
  0x22   : > { %p704_p9 = scmp.ne.s32.totalorder %s183_s8, %s703_s17  ;;  %p712_p6 = scmp.lt.s32.totalorder %s703_s17, %s703_s17 }
  0x24   : > { %p706_p13 = pnand %p704_p9, %p692_p2  ;;  %p713_p12 = por %p712_p6, %p711_p10 }
  0x26   : > { %p707_p11 = pneg %p706_p13 }
  0x28   : > { %p714_p5 = pnand %p713_p12, %p707_p11 }
  0x2a   : > { %717 = shalt.err (!%p714_p5)
}
  0x2b   : > { %s787_s23 = smov 128   ;;  %s788_s25 = smov 8  }
  0x2c   : > { %631 = dma.hbm_to_vmem [thread:$0]  (!%p886_p0), %s1009_s1, 512, %s183_s8, [#allocation4], %s787_s23, %s787_s23, %s788_s25  }
  0x2d   : > { %p579_p1 = scmp.ge.s32.totalorder %s784_s21, 2 }
  0x2e   : > { %p1022_p2 = scmp.ne.s32.totalorder (!%p579_p1), %s1017_s28, 0 }
  0x2f   : > { %195 = sbr.rel (%p579_p1) target bundleno = 61 (0x3d), region = 24 }
  0x36   : > { %198 = sbr.rel (!%p1022_p2) target bundleno = 61 (0x3d), region = 28  ;;  %s200_s10 = sand.u32 (%p1022_p2), 1, %s780_s20  }
  0x37   : > { %s581_s11 = sshll.u32 (%p1022_p2), %s784_s21, 3  ;;  %s580_s12 = sshll.u32 (%p1022_p2), %s200_s10, 4 }
  0x38   : > { %s204_s9 = scalar_lea.vmem (%p1022_p2), %s1008_s0, %s581_s11  ;;  %s202_s8 = scalar_lea.vmem (%p1022_p2), [#allocation2], %s580_s12 }
  0x39   : > { %v234_v0 = vld [vmem:[%s204_s9] sm:$0xff] (%p1022_p2)  ;;  %v236_v1 = vld [vmem:[%s204_s9 + $0x10] sm:$0xff] (%p1022_p2) }
  0x3a   : > { %235 = vst [vmem:[%s202_s8] sm:$0xff] (%p1022_p2), %v234_v0  ;;  %237 = vst [vmem:[%s202_s8 + $0x8] sm:$0xff] (%p1022_p2), %v236_v1 }
  0x3d PF: > { %p1023_p5 = scmp.ne.s32.totalorder %s1020_s6, 0 }
  0x3e   : > { %s263_s28 = sand.u32 (!%p1023_p5), 1, %s776_s19   ;;  %p1024_p6 = scmp.eq.s32.totalorder (!%p1023_p5), %s845_s22, 0 }
  0x3f   : > { %260 = sbr.rel (%p1023_p5) target bundleno = 789 (0x315), region = 74  ;;  %s921_s15 = sshll.u32 (!%p1023_p5), %s263_s28, 4 }
  0x40   : > { %s265_s16 = scalar_lea.vmem (!%p1023_p5), [#allocation2], %s921_s15 }
  0x46   : > { %763 = dma.done.wait (%p1024_p6), [#allocation4], 512   ;;  %p1025_p10 = pmov %p1024_p6 }
  0x47   : > { %vm323_vm0 = vcmask 261120   ;;  %v312_v2 = vld [vmem:[#allocation3] sm:$0xff]  ;;  %v313_v3 = vld [vmem:[#allocation3 + $0x8] sm:$0xff]  ;;  %v314_v4 = vld [vmem:[#allocation3 + $0x10] sm:$0xff]  ;;  %v789_v27 = vmov 0   ;;  %p302_p11 = scmp.lt.s32.totalorder %s845_s22, 1 }
  0x48   : > { %765 = vsyncadd (%p1025_p10), [#allocation4], 4294966784  ;;  %v614_v5 = vpack.c.bf16 %v313_v3, %v312_v2  ;;  %v315_v6 = vld [vmem:[#allocation3 + $0x18] sm:$0xff]  ;;  %v928_v7 = vld [vmem:[%s265_s16] sm:$0xff]  ;;  %678 = vset.pattern.permute.xlu1 %v789_v27  ;;  %679 = vset.pattern.permute.xlu0 %v789_v27  ;;  %s594_s14 = sshll.u32 %s845_s22, 7  ;;  %s301_s9 = scalar_lea.vmem [#allocation6], %s921_s15 }
  0x49   : > { %v618_v8 = vpack.c.bf16 %v315_v6, %v314_v4  ;;  %611 = vmatprep.mubr.msk.f32.mxu0 %vm323_vm0, %v928_v7  ;;  %v932_v9 = vld [vmem:[%s265_s16 + $0x8] sm:$0xff]  ;;  %v588_v10 = vld [vmem:[%s1010_s2] ss:$0 sm:$0xff]  ;;  %s303_s23 = scalar_select %p302_p11, %s845_s22, 1 }
  0x4a   : > { %615 = vmatprep.subr.bf16.mxu0 %v614_v5  ;;  %s472_s8 = sshll.u32 %s301_s9, 4  ;;  %s956_s17 = scalar_lea.hbm %s1013_s5, %s594_s14  ;;  %s959_s8 = int_to_ptr.vmem [resolvable:$true] %s472_s8 }
  0x4b   : > { %617 = vmatpush3.bf16.msra.mxu0 %v614_v5  ;;  %s586_s25 = sshll.u32 %s303_s23, 3  ;;  %s966_s22 = scalar_lea.sflag [#allocation5], %s263_s28 }
  0x4c   : > { %619 = vmatprep.subr.bf16.mxu0 %v618_v8  ;;  %s305_s10 = scalar_lea.vmem %s1011_s3, %s586_s25  ;;  %s309_s13 = scalar_lea.vmem %s1012_s4, %s586_s25 }
  0x4d   : > { %v424_v31 = vld [vmem:[%s305_s10] sm:$0xff]  ;;  %s718_s15 = scalar_lea.vmem %s959_s8, 256  ;;  %p1026_p0 = scmp.ne.s32.totalorder %s1018_s29, 0 }
  0x4e   : > { %v426_v34 = vld [vmem:[%s309_s13] sm:$0xff]  ;;  %p719_p12 = scmp.ne.s32.totalorder %s959_s8, %s718_s15  ;;  %s790_s23 = smov [#allocation6]  }
  0x4f   : > { %621 = vmatpush3.bf16.msra.mxu0 %v618_v8  ;;  %s722_s25 = sshll.u32 %s790_s23, 4  ;;  %s723_s25 = int_to_ptr.vmem [resolvable:$false] %s722_s25 }
  0x50   : > { %p720_p3 = pnand %p719_p12, %p1026_p0  ;;  %s724_s26 = scalar_lea.vmem %s723_s25, 512 }
  0x51   : > { %p725_p7 = scmp.lt.s32.totalorder %s959_s8, %s723_s25  ;;  %p726_p8 = scmp.lt.s32.totalorder %s724_s26, %s718_s15 }
  0x52   : > { %612 = vmatmul.mubr.msk.f32.vlgmr.msra.gmra.mrb[0].mxu0 %vm323_vm0, %v932_v9  ;;  %p721_p4 = pneg %p720_p3 }
  0x53   : > { %p727_p9 = por %p726_p8, %p725_p7 }
  0x55   : > { %p728_p13 = pnand %p727_p9, %p721_p4 }
 0x125   : > { %v613_v11 = vpop.f32.mrb[0].mxu0 }
 0x126   : > { %v402_v12 = vadd.f32 %v613_v11, %v588_v10  ;;  %v396_v13 = vpop.f32.mrb[1].mxu0 }
 0x127   : > { %v397_v14 = vadd.f32 %v588_v10, %v396_v13 }
 0x128   : > { %v406_v15 = vsel %vm323_vm0, %v402_v12, 0.0 }
 0x129   : > { %v405_v16 = vsel %vm323_vm0, %v397_v14, 0.0 }
 0x12a   : > { %v407_v17 = vadd.f32 %v406_v15, %v405_v16 }
 0x12c   : > { %408 = vadd.xlane.f32.xlu0 %v407_v17 }
 0x1b9   : > { %v409_v18 = vpop.xlane.xlu0 %408 }
 0x1ba   : > { %v411_v19 = vmul.f32 0.015625, %v409_v18 }
 0x1bc   : > { %v412_v20 = vsub.f32 %v397_v14, %v411_v19  ;;  %v413_v21 = vsub.f32 %v402_v12, %v411_v19 }
 0x1be   : > { %v414_v22 = vmul.f32 %v412_v20, %v412_v20  ;;  %v415_v23 = vmul.f32 %v413_v21, %v413_v21 }
 0x1c0   : > { %v416_v24 = vsel %vm323_vm0, %v414_v22, 0.0  ;;  %v417_v25 = vsel %vm323_vm0, %v415_v23, 0.0 }
 0x1c1   : > { %v418_v26 = vadd.f32 %v417_v25, %v416_v24 }
 0x1c3   : > { %419 = vadd.xlane.f32.xlu0 %v418_v26 }
 0x250   : > { %v420_v28 = vpop.xlane.xlu0 %419 }
 0x251   : > { %v421_v29 = vmul.f32 0.015625, %v420_v28 }
 0x253   : > { %v422_v30 = vadd.f32 1e-05, %v421_v29 }
 0x255   : > { %680 = vrsqrt.f32 %v422_v30 }
 0x25f   : > { %v681_v32 = vpop.eup %680 }
 0x260   : > { %v425_v33 = vmul.f32 %v681_v32, %v424_v31 }
 0x262   : > { %431 = vperm.xlu1 %678, %v425_v33   ;;  %v427_v35 = vmul.f32 %v425_v33, %v411_v19 }
 0x264   : > { %v428_v36 = vsub.f32 %v426_v34, %v427_v35 }
 0x266   : > { %438 = vperm.xlu1 %678, %v428_v36  }
 0x2e1   : > { %v432_v37 = vpop.permute.xlu1 %431 }
 0x2e2   : > { %v434_v38 = vmul.f32 %v432_v37, %v397_v14  ;;  %v435_v39 = vmul.f32 %v432_v37, %v402_v12 }
 0x2e5   : > { %v439_v40 = vpop.permute.xlu1 %438 }
 0x2e6   : > { %v441_v41 = vadd.f32 %v439_v40, %v434_v38  ;;  %v442_v42 = vadd.f32 %v439_v40, %v435_v39 }
 0x2e8   : > { %v591_v43 = vmul.f32 -1.442695, %v441_v41  ;;  %v592_v44 = vmul.f32 -1.442695, %v442_v42 }
 0x2ea   : > { %682 = vpow2.f32 %v591_v43 }
 0x2eb   : > { %684 = vpow2.f32 %v592_v44 }
 0x2f4   : > { %v683_v45 = vpop.eup %682 }
 0x2f5   : > { %v685_v46 = vpop.eup %684  ;;  %v449_v47 = vadd.f32 1.0, %v683_v45 }
 0x2f6   : > { %v450_v48 = vadd.f32 1.0, %v685_v46 }
 0x2f7   : > { %686 = vrcp.f32 %v449_v47 }
 0x2f8   : > { %688 = vrcp.f32 %v450_v48 }
 0x301   : > { %v687_v49 = vpop.eup %686 }
 0x302   : > { %v689_v50 = vpop.eup %688  ;;  %v455_v51 = vmul.f32 %v687_v49, %v928_v7 }
 0x303   : > { %v456_v52 = vmul.f32 %v689_v50, %v932_v9 }
 0x304   : > { %457 = vst.msk [vmem:[%s301_s9] sm:$0xff] %vm323_vm0, %v455_v51 }
 0x305   : > { %458 = vst.msk [vmem:[%s301_s9 + $0x8] sm:$0xff] %vm323_vm0, %v456_v52 }
 0x306   : > { %731 = shalt.err (!%p728_p13)
}
 0x307   : > { %s732_s28 = scalar_lea.hbm %s956_s17, 256  ;;  %s736_s11 = scalar_lea.hbm %s1013_s5, 512 }
 0x308   : > { %p733_p2 = scmp.ne.s32.totalorder %s956_s17, %s732_s28  ;;  %p737_p10 = scmp.lt.u32.totalorder %s956_s17, %s1013_s5 }
 0x309   : > { %p738_p11 = scmp.lt.u32.totalorder %s736_s11, %s732_s28  ;;  %p740_p3 = scmp.lt.u32.totalorder %s732_s28, %s956_s17 }
 0x30a   : > { %p734_p5 = pnand %p733_p2, %p1026_p0 }
 0x30b   : > { %p739_p12 = por %p738_p11, %p737_p10 }
 0x30c   : > { %p735_p6 = pneg %p734_p5 }
 0x30d   : > { %p741_p4 = por %p740_p3, %p739_p12 }
 0x30f   : > { %p742_p7 = pnand %p741_p4, %p735_p6 }
 0x311   : > { %745 = shalt.err (!%p742_p7)
}
 0x312   : > { %s791_s14 = smov 128   ;;  %s792_s9 = smov 256  }
 0x313   : > { %s793_s16 = smov 8  }
 0x314   : > { %626 = dma.vmem_to_hbm [thread:$0]  (%p1026_p0), %s959_s8, 256, %s956_s17, %s966_s22, %s791_s14, %s792_s9, %s793_s16  }
 0x315 PF: > { %s487_s6 = sand.u32 1, %s772_s18   ;;  %p1027_p8 = scmp.ne.s32.totalorder %s1019_s30, 0 }
 0x316   : > { %s488_s15 = scalar_lea.sflag [#allocation5], %s487_s6 }
 0x317   : > { %p633_p9 = pnand %p579_p1, %p1027_p8 }
 0x319   : > { %767 = dma.done.wait (!%p633_p9), %s488_s15, 256  }
 0x31a   : > { %769 = vsyncadd (!%p633_p9), %s488_s15, 4294967040  ;;  %p16_p13 = scmp.ge.s32.totalorder %s849_s24, 4   ;;  %s1028_s18 = smov %s776_s19 }
 0x31b   : > { %s1029_s19 = smov %s780_s20  ;;  %s1030_s20 = smov %s861_s27 }
 0x31c   : > { %s1031_s21 = smov %s849_s24  ;;  %18 = sbr.rel (!%p16_p13) target bundleno = 4 (0x4), region = 129 }
 0x323   :  { %493 = vsyncpa [#allocation4], 1 }
 0x324   :  { %495 = vsyncpa [#allocation4 + $0x1], 1 }
 0x325   :  { %496 = vsyncpa [#allocation5], 1 }
 0x326   :  { %498 = vsyncpa [#allocation5 + $0x1], 1 }

</bundles_post_ra>
